<compile_context>
chip_gen: v6e
topology: v6e:2x2x1
jax: 0.10.0
libtpu: 0.0.40
codegen_flags: <defaults>
</compile_context>

<pallas_src>
import functools

import jax
import jax.numpy as jnp
from jax.experimental import pallas as pl
from jax.experimental.pallas import tpu as pltpu


def _round_up(x, m):
    return ((x + m - 1) // m) * m


# ----------------------------------------------------------------------------
# Kernel: one (batch_tile, cell) grid step.
#   c == 0 : load the pre-projected P_0 block (embedding with W_in[0], b[0]
#            already folded in) into the resident output block.
#   c  > 0 : in-place chunked input projection  P^{(c)}_t = h^{(c-1)}_t @ W_in + b
#   then   : serial in-place recurrence  h_t = tanh(h_{t-1} @ W_hh + P_t)
# The output block is revisited (same block index) across the inner `c` axis,
# so it stays VMEM-resident and carries activations between cells.
# ----------------------------------------------------------------------------
def _rnn_family_kernel(p0_ref, wx_ref, wh_ref, b_ref, out_ref, *,
                       seq_len, n_tile, h_pad, proj_chunk):
    c = pl.program_id(1)

    # ---- cell 0: P_0 was computed in the wrapper (fold + gather) ----
    @pl.when(c == 0)
    def _():
        out_ref[...] = p0_ref[...]

    # ---- cells >= 1: hoisted input projection, chunked + in place ----
    @pl.when(c > 0)
    def _():
        w_in = wx_ref[...]                              # (Hp, Hp)
        b = b_ref[...]                                  # (1, Hp), f32
        for t0 in range(0, seq_len, proj_chunk):
            tc = min(proj_chunk, seq_len - t0)
            xc = out_ref[t0:t0 + tc].reshape(tc * n_tile, h_pad)   # h^{(c-1)}
            pc = jnp.dot(xc.astype(wx_ref.dtype), w_in,
                         preferred_element_type=jnp.float32) + b
            out_ref[t0:t0 + tc] = pc.reshape(tc, n_tile, h_pad)

    # ---- serial recurrence (in place: read P_t, write h_t) ----
    w_hh = wh_ref[...]                                  # (Hp, Hp)

    def step(t, h_prev):
        pre = jnp.dot(h_prev.astype(wh_ref.dtype), w_hh,
                      preferred_element_type=jnp.float32) + out_ref[t]
        h_new = jnp.tanh(pre)                           # (nt, Hp) f32
        out_ref[t] = h_new
        return h_new

    h0 = jnp.zeros((n_tile, h_pad), jnp.float32)
    jax.lax.fori_loop(0, seq_len, step, h0, unroll=min(seq_len, 8))


# ----------------------------------------------------------------------------
# Wrapper.
# ----------------------------------------------------------------------------
@functools.partial(jax.jit, static_argnames=("use_bf16",))
def rnn_family_forward(x_ids, emb, w_in_stack, w_hh_stack, b_stack,
                       use_bf16=False):
    """
    x_ids:      (N, L) int token ids
    emb:        (V, H) f32 embedding table
    w_in_stack: (C, H, H) f32   input->hidden weights per cell
    w_hh_stack: (C, H, H) f32   hidden->hidden weights per cell
    b_stack:    (C, 1, H) f32   bias per cell
    returns memories: (N, L, H) f32
    """
    n, l = x_ids.shape
    _, h = emb.shape
    c_cells = w_in_stack.shape[0]

    n_tile = 8                                   # sublane-dense batch tile
    np_ = max(n_tile, _round_up(n, n_tile))
    nb = np_ // n_tile
    h_pad = _round_up(h, 128)                    # lane-dense hidden

    f32 = jnp.float32
    emb_p = jnp.pad(emb.astype(f32), ((0, 0), (0, h_pad - h)))
    w_in_p = jnp.pad(w_in_stack.astype(f32),
                     ((0, 0), (0, h_pad - h), (0, h_pad - h)))
    w_hh_p = jnp.pad(w_hh_stack.astype(f32),
                     ((0, 0), (0, h_pad - h), (0, h_pad - h)))
    b_p = jnp.pad(b_stack.astype(f32), ((0, 0), (0, 0), (0, h_pad - h)))

    # Fold layer-0 projection + bias into the embedding table (tiny XLA matmul,
    # full f32 precision), then a real gather -> P_0 directly.  Padded batch
    # rows reuse token 0; their results are discarded at the end.
    emb0 = jnp.dot(emb_p, w_in_p[0],
                   precision=jax.lax.Precision.HIGHEST) + b_p[0]       # (V, Hp)
    ids = jnp.pad(x_ids.astype(jnp.int32), ((0, np_ - n), (0, 0)))     # (Np, L)
    p0 = jnp.take(emb0, ids, axis=0)                                   # (Np, L, Hp)
    p0 = p0.reshape(nb, n_tile, l, h_pad).transpose(0, 2, 1, 3)        # (NB, L, nt, Hp)
    # TODO(synk): for very large N*L*H, replace this XLA-side gather with an
    # in-kernel DMA row-gather (scalar-prefetch ids + make_async_copy) to avoid
    # one extra HBM pass over the layer-0 activations.

    wdt = jnp.bfloat16 if use_bf16 else f32
    w_in_k = w_in_p.astype(wdt)
    w_hh_k = w_hh_p.astype(wdt)

    proj_chunk = min(l, max(1, 512 // n_tile))   # <=512 rows live per chunk

    # Explicit VMEM budget: resident (double-buffered) blocks + temporaries.
    wbytes = 2 if use_bf16 else 4
    resident = (2 * (l * n_tile * h_pad) * 4           # P_0 block
                + 2 * (l * n_tile * h_pad) * 4         # output (carrier) block
                + 2 * 2 * (h_pad * h_pad) * wbytes     # W_in + W_hh blocks
                + 2 * (8 * h_pad) * 4)                 # bias block
    temporaries = 4 * (proj_chunk * n_tile * h_pad) * 4
    vmem_limit = int(min(112 * 2**20,
                         max(resident + temporaries + 8 * 2**20, 32 * 2**20)))
    # TODO(synk): if l * n_tile * h_pad * 4 exceeds ~24 MiB (v7x: 64 MiB VMEM),
    # stream the activation carrier through HBM with a manual double-buffered
    # make_async_copy instead of keeping the whole block resident.

    kernel = functools.partial(_rnn_family_kernel, seq_len=l, n_tile=n_tile,
                               h_pad=h_pad, proj_chunk=proj_chunk)

    out = pl.pallas_call(
        kernel,
        out_shape=jax.ShapeDtypeStruct((nb, l, n_tile, h_pad), f32),
        grid=(nb, c_cells),
        in_specs=[
            pl.BlockSpec((None, l, n_tile, h_pad), lambda i, c: (i, 0, 0, 0)),
            pl.BlockSpec((None, h_pad, h_pad), lambda i, c: (c, 0, 0)),
            pl.BlockSpec((None, h_pad, h_pad), lambda i, c: (c, 0, 0)),
            pl.BlockSpec((None, 1, h_pad), lambda i, c: (c, 0, 0)),
        ],
        out_specs=pl.BlockSpec((None, l, n_tile, h_pad),
                               lambda i, c: (i, 0, 0, 0)),
        compiler_params=pltpu.CompilerParams(
            dimension_semantics=("parallel", "arbitrary"),
            vmem_limit_bytes=vmem_limit),
    )(p0, w_in_k, w_hh_k, b_p)

    # (NB, L, nt, Hp) -> (N, L, H)
    out = out.transpose(0, 2, 1, 3).reshape(np_, l, h_pad)
    return out[:n, :, :h]


# ----------------------------------------------------------------------------
# Pure-JAX reference for verification.
# ----------------------------------------------------------------------------
def rnn_family_ref(x_ids, emb, w_in_stack, w_hh_stack, b_stack):
    h = emb[x_ids]                                                # (N, L, H)
    n, _, hd = h.shape
    for ci in range(w_in_stack.shape[0]):
        w_in, w_hh, b = w_in_stack[ci], w_hh_stack[ci], b_stack[ci]

        def step(h_prev, x_t, w_in=w_in, w_hh=w_hh, b=b):
            h_new = jnp.tanh(x_t @ w_in + h_prev @ w_hh + b[0])
            return h_new, h_new

        _, ys = jax.lax.scan(step, jnp.zeros((n, hd), jnp.float32),
                             jnp.transpose(h, (1, 0, 2)))
        h = jnp.transpose(ys, (1, 0, 2))
    return h


if __name__ == "__main__":
    # Small shapes consistent with the module's forward: x is (N, L) int ids.
    N, L = 2, 8
    VOCAB, HIDDEN = 10, 32
    NUM_CELLS = 2

    key = jax.random.PRNGKey(0)
    k_ids, k_emb, k_win, k_whh, k_b = jax.random.split(key, 5)

    x_ids = jax.random.randint(k_ids, (N, L), 0, VOCAB, dtype=jnp.int32)
    emb = jax.random.normal(k_emb, (VOCAB, HIDDEN), dtype=jnp.float32)
    w_in_stack = jax.random.normal(
        k_win, (NUM_CELLS, HIDDEN, HIDDEN), jnp.float32) * 0.1
    w_hh_stack = jax.random.normal(
        k_whh, (NUM_CELLS, HIDDEN, HIDDEN), jnp.float32) * 0.1
    b_stack = jax.random.normal(
        k_b, (NUM_CELLS, 1, HIDDEN), jnp.float32) * 0.1

    out = rnn_family_forward(x_ids, emb, w_in_stack, w_hh_stack, b_stack)
    out = jax.block_until_ready(out)
    assert out.shape == (N, L, HIDDEN), out.shape

    ref = rnn_family_ref(x_ids, emb, w_in_stack, w_hh_stack, b_stack)
    err = float(jnp.max(jnp.abs(out - ref)))
    assert err < 2e-4, err

    print("KERNEL_OK")
</pallas_src>

<mosaic_0001>
module attributes {stable_mosaic.version = 11 : i64} {
  func.func @_rnn_family_kernel(%arg0: i32, %arg1: i32, %arg2: memref<1x8x8x128xf32, #tpu.memory_space<vmem>>, %arg3: memref<1x128x128xf32, #tpu.memory_space<vmem>>, %arg4: memref<1x128x128xf32, #tpu.memory_space<vmem>>, %arg5: memref<1x1x128xf32, #tpu.memory_space<vmem>>, %arg6: memref<1x8x8x128xf32, #tpu.memory_space<vmem>>) attributes {dimension_semantics = [#tpu.dimension_semantics<parallel>, #tpu.dimension_semantics<arbitrary>], iteration_bounds = array<i64: 1, 2>, scalar_prefetch = 0 : i64, scratch_operands = 0 : i64, tpu.core_type = #tpu.core_type<tc>, window_params = [{transform_indices = @transform_0, window_bounds = array<i64: 1, 8, 8, 128>}, {transform_indices = @transform_1, window_bounds = array<i64: 1, 128, 128>}, {transform_indices = @transform_2, window_bounds = array<i64: 1, 128, 128>}, {transform_indices = @transform_3, window_bounds = array<i64: 1, 1, 128>}, {transform_indices = @transform_4, window_bounds = array<i64: 1, 8, 8, 128>}]} {
    %c0_i32 = arith.constant 0 : i32
    %0 = arith.cmpi eq, %arg1, %c0_i32 : i32
    %1 = arith.extui %0 : i1 to i32
    %c0_i32_0 = arith.constant 0 : i32
    %2 = arith.cmpi ne, %1, %c0_i32_0 : i32
    scf.if %2 {
      %c0_62 = arith.constant 0 : index
      %c0_63 = arith.constant 0 : index
      %c0_64 = arith.constant 0 : index
      %c0_65 = arith.constant 0 : index
      %89 = vector.load %arg2[%c0_62, %c0_63, %c0_64, %c0_65] : memref<1x8x8x128xf32, #tpu.memory_space<vmem>>, vector<1x8x8x128xf32>
      %90 = vector.shape_cast %89 : vector<1x8x8x128xf32> to vector<8x8x128xf32>
      %c0_66 = arith.constant 0 : index
      %c0_67 = arith.constant 0 : index
      %c0_68 = arith.constant 0 : index
      %c0_69 = arith.constant 0 : index
      %91 = vector.load %arg6[%c0_66, %c0_67, %c0_68, %c0_69] : memref<1x8x8x128xf32, #tpu.memory_space<vmem>>, vector<1x8x8x128xf32>
      %92 = vector.shape_cast %91 : vector<1x8x8x128xf32> to vector<8x8x128xf32>
      %93 = vector.shape_cast %90 : vector<8x8x128xf32> to vector<1x8x8x128xf32>
      tpu.vector_store %arg6[%c0_66, %c0_67, %c0_68, %c0_69], %93 {strides = array<i32>} : memref<1x8x8x128xf32, #tpu.memory_space<vmem>>, vector<1x8x8x128xf32>,
    } else {
    }
    %c0_i32_1 = arith.constant 0 : i32
    %3 = arith.cmpi sgt, %arg1, %c0_i32_1 : i32
    %4 = arith.extui %3 : i1 to i32
    %c0_i32_2 = arith.constant 0 : i32
    %5 = arith.cmpi ne, %4, %c0_i32_2 : i32
    scf.if %5 {
      %c0_62 = arith.constant 0 : index
      %c0_63 = arith.constant 0 : index
      %c0_64 = arith.constant 0 : index
      %89 = vector.load %arg3[%c0_62, %c0_63, %c0_64] : memref<1x128x128xf32, #tpu.memory_space<vmem>>, vector<1x128x128xf32>
      %90 = vector.shape_cast %89 : vector<1x128x128xf32> to vector<128x128xf32>
      %c0_65 = arith.constant 0 : index
      %c0_66 = arith.constant 0 : index
      %c0_67 = arith.constant 0 : index
      %91 = vector.load %arg5[%c0_65, %c0_66, %c0_67] : memref<1x1x128xf32, #tpu.memory_space<vmem>>, vector<1x1x128xf32>
      %92 = vector.shape_cast %91 : vector<1x1x128xf32> to vector<1x128xf32>
      %c0_68 = arith.constant 0 : index
      %c0_69 = arith.constant 0 : index
      %c0_70 = arith.constant 0 : index
      %c0_71 = arith.constant 0 : index
      %93 = vector.load %arg6[%c0_68, %c0_69, %c0_70, %c0_71] : memref<1x8x8x128xf32, #tpu.memory_space<vmem>>, vector<1x8x8x128xf32>
      %94 = vector.shape_cast %93 : vector<1x8x8x128xf32> to vector<8x8x128xf32>
      %95 = vector.shape_cast %94 : vector<8x8x128xf32> to vector<64x128xf32>
      %cst_72 = arith.constant dense<0.000000e+00> : vector<64x128xf32>
      %96 = tpu.matmul %95, %90, %cst_72 {dimension_numbers = #tpu.dot_dimension_numbers<[1], [0], [0], [1], [0, 0, 1, 1], [], []>} : vector<64x128xf32>, vector<128x128xf32>, vector<64x128xf32> -> vector<64x128xf32>
      %97 = vector.broadcast %92 : vector<1x128xf32> to vector<64x128xf32>
      %98 = arith.addf %96, %97 : vector<64x128xf32>
      %99 = vector.shape_cast %98 : vector<64x128xf32> to vector<8x8x128xf32>
      %c0_73 = arith.constant 0 : index
      %c0_74 = arith.constant 0 : index
      %c0_75 = arith.constant 0 : index
      %c0_76 = arith.constant 0 : index
      %100 = vector.load %arg6[%c0_73, %c0_74, %c0_75, %c0_76] : memref<1x8x8x128xf32, #tpu.memory_space<vmem>>, vector<1x8x8x128xf32>
      %101 = vector.shape_cast %100 : vector<1x8x8x128xf32> to vector<8x8x128xf32>
      %102 = vector.shape_cast %99 : vector<8x8x128xf32> to vector<1x8x8x128xf32>
      tpu.vector_store %arg6[%c0_73, %c0_74, %c0_75, %c0_76], %102 {strides = array<i32>} : memref<1x8x8x128xf32, #tpu.memory_space<vmem>>, vector<1x8x8x128xf32>,
    } else {
    }
    %c0 = arith.constant 0 : index
    %c0_3 = arith.constant 0 : index
    %c0_4 = arith.constant 0 : index
    %6 = vector.load %arg4[%c0, %c0_3, %c0_4] : memref<1x128x128xf32, #tpu.memory_space<vmem>>, vector<1x128x128xf32>
    %7 = vector.shape_cast %6 : vector<1x128x128xf32> to vector<128x128xf32>
    %cst = arith.constant 0.000000e+00 : f32
    %8 = vector.broadcast %cst : f32 to vector<8x128xf32>
    %c0_i32_5 = arith.constant 0 : i32
    %cst_6 = arith.constant dense<0.000000e+00> : vector<8x128xf32>
    %9 = tpu.matmul %8, %7, %cst_6 {dimension_numbers = #tpu.dot_dimension_numbers<[1], [0], [0], [1], [0, 0, 1, 1], [], []>} : vector<8x128xf32>, vector<128x128xf32>, vector<8x128xf32> -> vector<8x128xf32>
    %c0_7 = arith.constant 0 : index
    %10 = arith.index_cast %c0_i32_5 : i32 to index
    %c0_8 = arith.constant 0 : index
    %c0_9 = arith.constant 0 : index
    %11 = vector.load %arg6[%c0_7, %10, %c0_8, %c0_9] : memref<1x8x8x128xf32, #tpu.memory_space<vmem>>, vector<1x1x8x128xf32>
    %12 = vector.shape_cast %11 : vector<1x1x8x128xf32> to vector<8x128xf32>
    %13 = arith.addf %9, %12 : vector<8x128xf32>
    %14 = math.tanh %13 : vector<8x128xf32>
    %c0_10 = arith.constant 0 : index
    %15 = arith.index_cast %c0_i32_5 : i32 to index
    %c0_11 = arith.constant 0 : index
    %c0_12 = arith.constant 0 : index
    %16 = vector.load %arg6[%c0_10, %15, %c0_11, %c0_12] : memref<1x8x8x128xf32, #tpu.memory_space<vmem>>, vector<1x1x8x128xf32>
    %17 = vector.shape_cast %16 : vector<1x1x8x128xf32> to vector<8x128xf32>
    %18 = vector.shape_cast %14 : vector<8x128xf32> to vector<1x1x8x128xf32>
    tpu.vector_store %arg6[%c0_10, %15, %c0_11, %c0_12], %18 {strides = array<i32>} : memref<1x8x8x128xf32, #tpu.memory_space<vmem>>, vector<1x1x8x128xf32>,
    %c1_i32 = arith.constant 1 : i32
    %cst_13 = arith.constant dense<0.000000e+00> : vector<8x128xf32>
    %19 = tpu.matmul %14, %7, %cst_13 {dimension_numbers = #tpu.dot_dimension_numbers<[1], [0], [0], [1], [0, 0, 1, 1], [], []>} : vector<8x128xf32>, vector<128x128xf32>, vector<8x128xf32> -> vector<8x128xf32>
    %c0_14 = arith.constant 0 : index
    %20 = arith.index_cast %c1_i32 : i32 to index
    %c0_15 = arith.constant 0 : index
    %c0_16 = arith.constant 0 : index
    %21 = vector.load %arg6[%c0_14, %20, %c0_15, %c0_16] : memref<1x8x8x128xf32, #tpu.memory_space<vmem>>, vector<1x1x8x128xf32>
    %22 = vector.shape_cast %21 : vector<1x1x8x128xf32> to vector<8x128xf32>
    %23 = arith.addf %19, %22 : vector<8x128xf32>
    %24 = math.tanh %23 : vector<8x128xf32>
    %c0_17 = arith.constant 0 : index
    %25 = arith.index_cast %c1_i32 : i32 to index
    %c0_18 = arith.constant 0 : index
    %c0_19 = arith.constant 0 : index
    %26 = vector.load %arg6[%c0_17, %25, %c0_18, %c0_19] : memref<1x8x8x128xf32, #tpu.memory_space<vmem>>, vector<1x1x8x128xf32>
    %27 = vector.shape_cast %26 : vector<1x1x8x128xf32> to vector<8x128xf32>
    %28 = vector.shape_cast %24 : vector<8x128xf32> to vector<1x1x8x128xf32>
    tpu.vector_store %arg6[%c0_17, %25, %c0_18, %c0_19], %28 {strides = array<i32>} : memref<1x8x8x128xf32, #tpu.memory_space<vmem>>, vector<1x1x8x128xf32>,
    %c2_i32 = arith.constant 2 : i32
    %cst_20 = arith.constant dense<0.000000e+00> : vector<8x128xf32>
    %29 = tpu.matmul %24, %7, %cst_20 {dimension_numbers = #tpu.dot_dimension_numbers<[1], [0], [0], [1], [0, 0, 1, 1], [], []>} : vector<8x128xf32>, vector<128x128xf32>, vector<8x128xf32> -> vector<8x128xf32>
    %c0_21 = arith.constant 0 : index
    %30 = arith.index_cast %c2_i32 : i32 to index
    %c0_22 = arith.constant 0 : index
    %c0_23 = arith.constant 0 : index
    %31 = vector.load %arg6[%c0_21, %30, %c0_22, %c0_23] : memref<1x8x8x128xf32, #tpu.memory_space<vmem>>, vector<1x1x8x128xf32>
    %32 = vector.shape_cast %31 : vector<1x1x8x128xf32> to vector<8x128xf32>
    %33 = arith.addf %29, %32 : vector<8x128xf32>
    %34 = math.tanh %33 : vector<8x128xf32>
    %c0_24 = arith.constant 0 : index
    %35 = arith.index_cast %c2_i32 : i32 to index
    %c0_25 = arith.constant 0 : index
    %c0_26 = arith.constant 0 : index
    %36 = vector.load %arg6[%c0_24, %35, %c0_25, %c0_26] : memref<1x8x8x128xf32, #tpu.memory_space<vmem>>, vector<1x1x8x128xf32>
    %37 = vector.shape_cast %36 : vector<1x1x8x128xf32> to vector<8x128xf32>
    %38 = vector.shape_cast %34 : vector<8x128xf32> to vector<1x1x8x128xf32>
    tpu.vector_store %arg6[%c0_24, %35, %c0_25, %c0_26], %38 {strides = array<i32>} : memref<1x8x8x128xf32, #tpu.memory_space<vmem>>, vector<1x1x8x128xf32>,
    %c3_i32 = arith.constant 3 : i32
    %cst_27 = arith.constant dense<0.000000e+00> : vector<8x128xf32>
    %39 = tpu.matmul %34, %7, %cst_27 {dimension_numbers = #tpu.dot_dimension_numbers<[1], [0], [0], [1], [0, 0, 1, 1], [], []>} : vector<8x128xf32>, vector<128x128xf32>, vector<8x128xf32> -> vector<8x128xf32>
    %c0_28 = arith.constant 0 : index
    %40 = arith.index_cast %c3_i32 : i32 to index
    %c0_29 = arith.constant 0 : index
    %c0_30 = arith.constant 0 : index
    %41 = vector.load %arg6[%c0_28, %40, %c0_29, %c0_30] : memref<1x8x8x128xf32, #tpu.memory_space<vmem>>, vector<1x1x8x128xf32>
    %42 = vector.shape_cast %41 : vector<1x1x8x128xf32> to vector<8x128xf32>
    %43 = arith.addf %39, %42 : vector<8x128xf32>
    %44 = math.tanh %43 : vector<8x128xf32>
    %c0_31 = arith.constant 0 : index
    %45 = arith.index_cast %c3_i32 : i32 to index
    %c0_32 = arith.constant 0 : index
    %c0_33 = arith.constant 0 : index
    %46 = vector.load %arg6[%c0_31, %45, %c0_32, %c0_33] : memref<1x8x8x128xf32, #tpu.memory_space<vmem>>, vector<1x1x8x128xf32>
    %47 = vector.shape_cast %46 : vector<1x1x8x128xf32> to vector<8x128xf32>
    %48 = vector.shape_cast %44 : vector<8x128xf32> to vector<1x1x8x128xf32>
    tpu.vector_store %arg6[%c0_31, %45, %c0_32, %c0_33], %48 {strides = array<i32>} : memref<1x8x8x128xf32, #tpu.memory_space<vmem>>, vector<1x1x8x128xf32>,
    %c4_i32 = arith.constant 4 : i32
    %cst_34 = arith.constant dense<0.000000e+00> : vector<8x128xf32>
    %49 = tpu.matmul %44, %7, %cst_34 {dimension_numbers = #tpu.dot_dimension_numbers<[1], [0], [0], [1], [0, 0, 1, 1], [], []>} : vector<8x128xf32>, vector<128x128xf32>, vector<8x128xf32> -> vector<8x128xf32>
    %c0_35 = arith.constant 0 : index
    %50 = arith.index_cast %c4_i32 : i32 to index
    %c0_36 = arith.constant 0 : index
    %c0_37 = arith.constant 0 : index
    %51 = vector.load %arg6[%c0_35, %50, %c0_36, %c0_37] : memref<1x8x8x128xf32, #tpu.memory_space<vmem>>, vector<1x1x8x128xf32>
    %52 = vector.shape_cast %51 : vector<1x1x8x128xf32> to vector<8x128xf32>
    %53 = arith.addf %49, %52 : vector<8x128xf32>
    %54 = math.tanh %53 : vector<8x128xf32>
    %c0_38 = arith.constant 0 : index
    %55 = arith.index_cast %c4_i32 : i32 to index
    %c0_39 = arith.constant 0 : index
    %c0_40 = arith.constant 0 : index
    %56 = vector.load %arg6[%c0_38, %55, %c0_39, %c0_40] : memref<1x8x8x128xf32, #tpu.memory_space<vmem>>, vector<1x1x8x128xf32>
    %57 = vector.shape_cast %56 : vector<1x1x8x128xf32> to vector<8x128xf32>
    %58 = vector.shape_cast %54 : vector<8x128xf32> to vector<1x1x8x128xf32>
    tpu.vector_store %arg6[%c0_38, %55, %c0_39, %c0_40], %58 {strides = array<i32>} : memref<1x8x8x128xf32, #tpu.memory_space<vmem>>, vector<1x1x8x128xf32>,
    %c5_i32 = arith.constant 5 : i32
    %cst_41 = arith.constant dense<0.000000e+00> : vector<8x128xf32>
    %59 = tpu.matmul %54, %7, %cst_41 {dimension_numbers = #tpu.dot_dimension_numbers<[1], [0], [0], [1], [0, 0, 1, 1], [], []>} : vector<8x128xf32>, vector<128x128xf32>, vector<8x128xf32> -> vector<8x128xf32>
    %c0_42 = arith.constant 0 : index
    %60 = arith.index_cast %c5_i32 : i32 to index
    %c0_43 = arith.constant 0 : index
    %c0_44 = arith.constant 0 : index
    %61 = vector.load %arg6[%c0_42, %60, %c0_43, %c0_44] : memref<1x8x8x128xf32, #tpu.memory_space<vmem>>, vector<1x1x8x128xf32>
    %62 = vector.shape_cast %61 : vector<1x1x8x128xf32> to vector<8x128xf32>
    %63 = arith.addf %59, %62 : vector<8x128xf32>
    %64 = math.tanh %63 : vector<8x128xf32>
    %c0_45 = arith.constant 0 : index
    %65 = arith.index_cast %c5_i32 : i32 to index
    %c0_46 = arith.constant 0 : index
    %c0_47 = arith.constant 0 : index
    %66 = vector.load %arg6[%c0_45, %65, %c0_46, %c0_47] : memref<1x8x8x128xf32, #tpu.memory_space<vmem>>, vector<1x1x8x128xf32>
    %67 = vector.shape_cast %66 : vector<1x1x8x128xf32> to vector<8x128xf32>
    %68 = vector.shape_cast %64 : vector<8x128xf32> to vector<1x1x8x128xf32>
    tpu.vector_store %arg6[%c0_45, %65, %c0_46, %c0_47], %68 {strides = array<i32>} : memref<1x8x8x128xf32, #tpu.memory_space<vmem>>, vector<1x1x8x128xf32>,
    %c6_i32 = arith.constant 6 : i32
    %cst_48 = arith.constant dense<0.000000e+00> : vector<8x128xf32>
    %69 = tpu.matmul %64, %7, %cst_48 {dimension_numbers = #tpu.dot_dimension_numbers<[1], [0], [0], [1], [0, 0, 1, 1], [], []>} : vector<8x128xf32>, vector<128x128xf32>, vector<8x128xf32> -> vector<8x128xf32>
    %c0_49 = arith.constant 0 : index
    %70 = arith.index_cast %c6_i32 : i32 to index
    %c0_50 = arith.constant 0 : index
    %c0_51 = arith.constant 0 : index
    %71 = vector.load %arg6[%c0_49, %70, %c0_50, %c0_51] : memref<1x8x8x128xf32, #tpu.memory_space<vmem>>, vector<1x1x8x128xf32>
    %72 = vector.shape_cast %71 : vector<1x1x8x128xf32> to vector<8x128xf32>
    %73 = arith.addf %69, %72 : vector<8x128xf32>
    %74 = math.tanh %73 : vector<8x128xf32>
    %c0_52 = arith.constant 0 : index
    %75 = arith.index_cast %c6_i32 : i32 to index
    %c0_53 = arith.constant 0 : index
    %c0_54 = arith.constant 0 : index
    %76 = vector.load %arg6[%c0_52, %75, %c0_53, %c0_54] : memref<1x8x8x128xf32, #tpu.memory_space<vmem>>, vector<1x1x8x128xf32>
    %77 = vector.shape_cast %76 : vector<1x1x8x128xf32> to vector<8x128xf32>
    %78 = vector.shape_cast %74 : vector<8x128xf32> to vector<1x1x8x128xf32>
    tpu.vector_store %arg6[%c0_52, %75, %c0_53, %c0_54], %78 {strides = array<i32>} : memref<1x8x8x128xf32, #tpu.memory_space<vmem>>, vector<1x1x8x128xf32>,
    %c7_i32 = arith.constant 7 : i32
    %cst_55 = arith.constant dense<0.000000e+00> : vector<8x128xf32>
    %79 = tpu.matmul %74, %7, %cst_55 {dimension_numbers = #tpu.dot_dimension_numbers<[1], [0], [0], [1], [0, 0, 1, 1], [], []>} : vector<8x128xf32>, vector<128x128xf32>, vector<8x128xf32> -> vector<8x128xf32>
    %c0_56 = arith.constant 0 : index
    %80 = arith.index_cast %c7_i32 : i32 to index
    %c0_57 = arith.constant 0 : index
    %c0_58 = arith.constant 0 : index
    %81 = vector.load %arg6[%c0_56, %80, %c0_57, %c0_58] : memref<1x8x8x128xf32, #tpu.memory_space<vmem>>, vector<1x1x8x128xf32>
    %82 = vector.shape_cast %81 : vector<1x1x8x128xf32> to vector<8x128xf32>
    %83 = arith.addf %79, %82 : vector<8x128xf32>
    %84 = math.tanh %83 : vector<8x128xf32>
    %c0_59 = arith.constant 0 : index
    %85 = arith.index_cast %c7_i32 : i32 to index
    %c0_60 = arith.constant 0 : index
    %c0_61 = arith.constant 0 : index
    %86 = vector.load %arg6[%c0_59, %85, %c0_60, %c0_61] : memref<1x8x8x128xf32, #tpu.memory_space<vmem>>, vector<1x1x8x128xf32>
    %87 = vector.shape_cast %86 : vector<1x1x8x128xf32> to vector<8x128xf32>
    %88 = vector.shape_cast %84 : vector<8x128xf32> to vector<1x1x8x128xf32>
    tpu.vector_store %arg6[%c0_59, %85, %c0_60, %c0_61], %88 {strides = array<i32>} : memref<1x8x8x128xf32, #tpu.memory_space<vmem>>, vector<1x1x8x128xf32>,
    %c8_i32 = arith.constant 8 : i32
    return
  }
  func.func @transform_0(%arg0: i32, %arg1: i32) -> (i32, i32, i32, i32) {
    %c0_i32 = arith.constant 0 : i32
    %c0_i32_0 = arith.constant 0 : i32
    %c0_i32_1 = arith.constant 0 : i32
    %c0_i32_2 = arith.constant 0 : i32
    return %arg0, %c0_i32, %c0_i32_0, %c0_i32_1 : i32, i32, i32, i32
  }
  func.func @transform_1(%arg0: i32, %arg1: i32) -> (i32, i32, i32) {
    %c0_i32 = arith.constant 0 : i32
    %c0_i32_0 = arith.constant 0 : i32
    %c0_i32_1 = arith.constant 0 : i32
    return %arg1, %c0_i32, %c0_i32_0 : i32, i32, i32
  }
  func.func @transform_2(%arg0: i32, %arg1: i32) -> (i32, i32, i32) {
    %c0_i32 = arith.constant 0 : i32
    %c0_i32_0 = arith.constant 0 : i32
    %c0_i32_1 = arith.constant 0 : i32
    return %arg1, %c0_i32, %c0_i32_0 : i32, i32, i32
  }
  func.func @transform_3(%arg0: i32, %arg1: i32) -> (i32, i32, i32) {
    %c0_i32 = arith.constant 0 : i32
    %c0_i32_0 = arith.constant 0 : i32
    %c0_i32_1 = arith.constant 0 : i32
    return %arg1, %c0_i32, %c0_i32_0 : i32, i32, i32
  }
  func.func @transform_4(%arg0: i32, %arg1: i32) -> (i32, i32, i32, i32) {
    %c0_i32 = arith.constant 0 : i32
    %c0_i32_0 = arith.constant 0 : i32
    %c0_i32_1 = arith.constant 0 : i32
    %c0_i32_2 = arith.constant 0 : i32
    return %arg0, %c0_i32, %c0_i32_0, %c0_i32_1 : i32, i32, i32, i32
  }
}

</mosaic_0001>

<bundles_post_ra>
// kernel: rnn_family_forward.1
= control target key start
LH: loop header
LB: loop body
LE: loop exit
PB: predicated region body
PF: predicated region fallthrough
CT: control target
= control target key end

     0   :  { %s1776_s15 = smov 0   ;;  %s1778_s16 = smov 0   ;;  %s2312_s0 = inlined_call_operand.vmem [shape: f32[1,8,8,128], index: 0, kind: input, shape index: {}]   ;;  %s2313_s1 = inlined_call_operand.vmem [shape: f32[2,128,128], index: 1, kind: input, shape index: {}]   ;;  %s2314_s2 = inlined_call_operand.vmem [shape: f32[2,128,128], index: 2, kind: input, shape index: {}]   ;;  %s2315_s3 = inlined_call_operand.vmem [shape: f32[2,1,128], index: 3, kind: input, shape index: {}]   ;;  %s2316_s4 = inlined_call_operand.vmem [shape: f32[1,8,8,128], index: 4, kind: output, shape index: {}]  }
   0x1   :  { %s1780_s17 = smov 0  }
   0x2 LB: > { %s23_s18 = sadd.s32 1, %s1743_s16  ;;  %p1140_p0 = scmp.ge.s32.totalorder %s1747_s17, 1  ;;  %s1747_s17 = sphi %s1780_s17, %s14_s17   ;;  %s1743_s16 = sphi %s1778_s16, %s2318_s16   ;;  %s1739_s15 = sphi %s1776_s15, %s2317_s15  }
   0x3   : > { %p24_p1 = scmp.ge.s32.totalorder %s23_s18, 2  ;;  %p202_p2 = scmp.lt.s32.totalorder %s1747_s17, 3 }
   0x5   : > { %s2320_s18 = smov (%p24_p1, %s23_s18), 0  ;;  %p203_p3 = pnand %p1140_p0, %p202_p2 }
   0x6   : > { %p246_p4 = scmp.lt.s32.totalorder (!%p203_p3), %s1739_s15, 1  ;;  %p1145_p5 = scmp.ne.s32.totalorder (!%p203_p3), %s1739_s15, 0 }
   0x7   : > { %206 = sbr.rel (%p203_p3) target bundleno = 1972 (0x7b4), region = 36 }
   0xc   : > { %s1798_s19 = scalar_select %p246_p4, %s1739_s15, 1 }
   0xd   : > { %267 = sbr.rel (%p1145_p5) target bundleno = 23 (0x17), region = 40 }
   0xe   : > { %s1165_s20 = sshll.u32 %s1798_s19, 7  ;;  %s258_s23 = scalar_lea.vmem %s2315_s3, %s1798_s19 }
   0xf   : > { %s1808_s26 = scalar_lea.vmem %s2313_s1, %s1165_s20  ;;  %s1813_s29 = scalar_lea.vmem %s2314_s2, %s1165_s20 }
  0x12   : > { %v268_v0 = vld [vmem:[%s2312_s0] sm:$0xff]  ;;  %v269_v1 = vld [vmem:[%s2312_s0 + $0x8] sm:$0xff]  ;;  %v270_v2 = vld [vmem:[%s2312_s0 + $0x10] sm:$0xff] }
  0x13   : > { %276 = vst [vmem:[%s2316_s4] sm:$0xff] %v268_v0  ;;  %277 = vst [vmem:[%s2316_s4 + $0x8] sm:$0xff] %v269_v1  ;;  %v271_v3 = vld [vmem:[%s2312_s0 + $0x18] sm:$0xff]  ;;  %v272_v4 = vld [vmem:[%s2312_s0 + $0x20] sm:$0xff] }
  0x14   : > { %278 = vst [vmem:[%s2316_s4 + $0x10] sm:$0xff] %v270_v2  ;;  %v273_v5 = vld [vmem:[%s2312_s0 + $0x28] sm:$0xff]  ;;  %279 = vst [vmem:[%s2316_s4 + $0x18] sm:$0xff] %v271_v3  ;;  %v274_v6 = vld [vmem:[%s2312_s0 + $0x30] sm:$0xff] }
  0x15   : > { %280 = vst [vmem:[%s2316_s4 + $0x20] sm:$0xff] %v272_v4  ;;  %281 = vst [vmem:[%s2316_s4 + $0x28] sm:$0xff] %v273_v5  ;;  %v275_v7 = vld [vmem:[%s2312_s0 + $0x38] sm:$0xff] }
  0x16   : > { %282 = vst [vmem:[%s2316_s4 + $0x30] sm:$0xff] %v274_v6  ;;  %283 = vst [vmem:[%s2316_s4 + $0x38] sm:$0xff] %v275_v7 }
  0x17 PF: > { %p1146_p6 = scmp.le.s32.totalorder %s1739_s15, 0 }
  0x19   : > { %287 = sbr.rel (%p1146_p6) target bundleno = 266 (0x10a), region = 44 }
  0x1e   : > { %v303_v8 = vld [vmem:[%s1808_s26 + $0x78] sm:$0xff]  ;;  %v302_v9 = vld [vmem:[%s1808_s26 + $0x70] sm:$0xff]  ;;  %v301_v10 = vld [vmem:[%s1808_s26 + $0x68] sm:$0xff] }
  0x1f   : > { %1327 = vmatprep.subr.mxu0 %v303_v8  ;;  %1651 = vmatprep.subr.mxu1 %v303_v8  ;;  %v300_v11 = vld [vmem:[%s1808_s26 + $0x60] sm:$0xff]  ;;  %v299_v12 = vld [vmem:[%s1808_s26 + $0x58] sm:$0xff]  ;;  %v298_v13 = vld [vmem:[%s1808_s26 + $0x50] sm:$0xff] }
  0x20   : > { %1328 = vmatpush3.msra.mxu0 %v303_v8  ;;  %1667 = vmatpush3.msra.mxu1 %v303_v8  ;;  %v297_v14 = vld [vmem:[%s1808_s26 + $0x48] sm:$0xff]  ;;  %v296_v15 = vld [vmem:[%s1808_s26 + $0x40] sm:$0xff]  ;;  %v295_v16 = vld [vmem:[%s1808_s26 + $0x38] sm:$0xff] }
  0x21   : > { %1329 = vmatprep.subr.mxu0 %v302_v9  ;;  %1652 = vmatprep.subr.mxu1 %v302_v9  ;;  %v294_v17 = vld [vmem:[%s1808_s26 + $0x30] sm:$0xff]  ;;  %v293_v18 = vld [vmem:[%s1808_s26 + $0x28] sm:$0xff]  ;;  %v292_v19 = vld [vmem:[%s1808_s26 + $0x20] sm:$0xff] }
  0x22   : > { %1330 = vmatpush3.msra.mxu0 %v302_v9  ;;  %1668 = vmatpush3.msra.mxu1 %v302_v9  ;;  %v291_v20 = vld [vmem:[%s1808_s26 + $0x18] sm:$0xff]  ;;  %v290_v21 = vld [vmem:[%s1808_s26 + $0x10] sm:$0xff]  ;;  %v289_v22 = vld [vmem:[%s1808_s26 + $0x8] sm:$0xff] }
  0x23   : > { %1331 = vmatprep.subr.mxu0 %v301_v10  ;;  %1653 = vmatprep.subr.mxu1 %v301_v10  ;;  %v288_v23 = vld [vmem:[%s1808_s26] sm:$0xff]  ;;  %v306_v26 = vld [vmem:[%s2316_s4 + $0x8] sm:$0xff]  ;;  %v307_v28 = vld [vmem:[%s2316_s4 + $0x10] sm:$0xff] }
  0x24   : > { %1332 = vmatpush3.msra.mxu0 %v301_v10  ;;  %1669 = vmatpush3.msra.mxu1 %v301_v10  ;;  %v305_v24 = vld [vmem:[%s2316_s4] sm:$0xff]  ;;  %v310_v27 = vld [vmem:[%s2316_s4 + $0x28] sm:$0xff]  ;;  %v311_v29 = vld [vmem:[%s2316_s4 + $0x30] sm:$0xff] }
  0x25   : > { %1333 = vmatprep.subr.mxu0 %v300_v11  ;;  %1654 = vmatprep.subr.mxu1 %v300_v11  ;;  %v309_v25 = vld [vmem:[%s2316_s4 + $0x20] sm:$0xff]  ;;  %v308_v30 = vld [vmem:[%s2316_s4 + $0x18] sm:$0xff] }
  0x26   : > { %1334 = vmatpush3.msra.mxu0 %v300_v11  ;;  %1670 = vmatpush3.msra.mxu1 %v300_v11  ;;  %v312_v31 = vld [vmem:[%s2316_s4 + $0x38] sm:$0xff]  ;;  %v1147_v32 = vld [vmem:[%s258_s23] ss:$0 sm:$0xff] }
  0x27   : > { %1335 = vmatprep.subr.mxu0 %v299_v12  ;;  %1655 = vmatprep.subr.mxu1 %v299_v12 }
  0x28   : > { %1336 = vmatpush3.msra.mxu0 %v299_v12  ;;  %1671 = vmatpush3.msra.mxu1 %v299_v12 }
  0x29   : > { %1337 = vmatprep.subr.mxu0 %v298_v13  ;;  %1656 = vmatprep.subr.mxu1 %v298_v13 }
  0x2a   : > { %1338 = vmatpush3.msra.mxu0 %v298_v13  ;;  %1672 = vmatpush3.msra.mxu1 %v298_v13 }
  0x2b   : > { %1339 = vmatprep.subr.mxu0 %v297_v14  ;;  %1657 = vmatprep.subr.mxu1 %v297_v14 }
  0x2c   : > { %1340 = vmatpush3.msra.mxu0 %v297_v14  ;;  %1673 = vmatpush3.msra.mxu1 %v297_v14 }
  0x2d   : > { %1341 = vmatprep.subr.mxu0 %v296_v15  ;;  %1658 = vmatprep.subr.mxu1 %v296_v15 }
  0x2e   : > { %1342 = vmatpush3.msra.mxu0 %v296_v15  ;;  %1674 = vmatpush3.msra.mxu1 %v296_v15 }
  0x2f   : > { %1343 = vmatprep.subr.mxu0 %v295_v16  ;;  %1659 = vmatprep.subr.mxu1 %v295_v16 }
  0x30   : > { %1344 = vmatpush3.msra.mxu0 %v295_v16  ;;  %1675 = vmatpush3.msra.mxu1 %v295_v16 }
  0x31   : > { %1345 = vmatprep.subr.mxu0 %v294_v17  ;;  %1660 = vmatprep.subr.mxu1 %v294_v17 }
  0x32   : > { %1346 = vmatpush3.msra.mxu0 %v294_v17  ;;  %1676 = vmatpush3.msra.mxu1 %v294_v17 }
  0x33   : > { %1347 = vmatprep.subr.mxu0 %v293_v18  ;;  %1661 = vmatprep.subr.mxu1 %v293_v18 }
  0x34   : > { %1348 = vmatpush3.msra.mxu0 %v293_v18  ;;  %1677 = vmatpush3.msra.mxu1 %v293_v18 }
  0x35   : > { %1349 = vmatprep.subr.mxu0 %v292_v19  ;;  %1662 = vmatprep.subr.mxu1 %v292_v19 }
  0x36   : > { %1350 = vmatpush3.msra.mxu0 %v292_v19  ;;  %1678 = vmatpush3.msra.mxu1 %v292_v19 }
  0x37   : > { %1351 = vmatprep.subr.mxu0 %v291_v20  ;;  %1663 = vmatprep.subr.mxu1 %v291_v20 }
  0x38   : > { %1352 = vmatpush3.msra.mxu0 %v291_v20  ;;  %1679 = vmatpush3.msra.mxu1 %v291_v20 }
  0x39   : > { %1353 = vmatprep.subr.mxu0 %v290_v21  ;;  %1664 = vmatprep.subr.mxu1 %v290_v21 }
  0x3a   : > { %1354 = vmatpush3.msra.mxu0 %v290_v21  ;;  %1680 = vmatpush3.msra.mxu1 %v290_v21 }
  0x3b   : > { %1355 = vmatprep.subr.mxu0 %v289_v22  ;;  %1665 = vmatprep.subr.mxu1 %v289_v22 }
  0x3c   : > { %1356 = vmatpush3.msra.mxu0 %v289_v22  ;;  %1681 = vmatpush3.msra.mxu1 %v289_v22 }
  0x3d   : > { %1357 = vmatprep.subr.mxu0 %v288_v23  ;;  %1666 = vmatprep.subr.mxu1 %v288_v23 }
  0x3e   : > { %1358 = vmatpush3.msra.mxu0 %v288_v23  ;;  %1682 = vmatpush3.msra.mxu1 %v288_v23 }
  0x3f   : > { %1359 = vmatprep.mubr.f32.mxu0 %v305_v24  ;;  %1365 = vmatprep.mubr.f32.mxu1 %v309_v25 }
  0x40   : > { %1360 = vmatmul.mubr.f32.vlgmr.msra.gmra.mxu0 %v306_v26  ;;  %1366 = vmatmul.mubr.f32.vlgmr.msra.gmra.mxu1 %v310_v27 }
  0x41   : > { %1362 = vmatprep.mubr.f32.mxu0 %v307_v28  ;;  %1368 = vmatprep.mubr.f32.mxu1 %v311_v29 }
  0x44   : > { %1363 = vmatmul.mubr.f32.gmra.mxu0 %v308_v30  ;;  %1369 = vmatmul.mubr.f32.gmra.mxu1 %v312_v31 }
 0x100   : > { %v1361_v33 = vpop.f32.mrf.mxu0  ;;  %v1367_v34 = vpop.f32.mrf.mxu1 }
 0x101   : > { %v391_v35 = vadd.f32 %v1361_v33, %v1147_v32  ;;  %v411_v36 = vadd.f32 %v1367_v34, %v1147_v32 }
 0x102   : > { %v385_v37 = vpop.f32.mrf.mxu0  ;;  %v405_v38 = vpop.f32.mrf.mxu1 }
 0x103   : > { %425 = vst [vmem:[%s2316_s4 + $0x8] sm:$0xff] %v391_v35  ;;  %429 = vst [vmem:[%s2316_s4 + $0x28] sm:$0xff] %v411_v36  ;;  %v386_v39 = vadd.f32 %v1147_v32, %v385_v37  ;;  %v406_v40 = vadd.f32 %v1147_v32, %v405_v38 }
 0x104   : > { %v1364_v41 = vpop.f32.mrf.mxu0  ;;  %v1370_v42 = vpop.f32.mrf.mxu1 }
 0x105   : > { %424 = vst [vmem:[%s2316_s4] sm:$0xff] %v386_v39  ;;  %428 = vst [vmem:[%s2316_s4 + $0x20] sm:$0xff] %v406_v40  ;;  %v401_v43 = vadd.f32 %v1364_v41, %v1147_v32  ;;  %v421_v44 = vadd.f32 %v1370_v42, %v1147_v32 }
 0x106   : > { %v395_v45 = vpop.f32.mrf.mxu0  ;;  %v415_v46 = vpop.f32.mrf.mxu1 }
 0x107   : > { %427 = vst [vmem:[%s2316_s4 + $0x18] sm:$0xff] %v401_v43  ;;  %431 = vst [vmem:[%s2316_s4 + $0x38] sm:$0xff] %v421_v44  ;;  %v396_v47 = vadd.f32 %v1147_v32, %v395_v45  ;;  %v416_v48 = vadd.f32 %v1147_v32, %v415_v46 }
 0x109   : > { %426 = vst [vmem:[%s2316_s4 + $0x10] sm:$0xff] %v396_v47  ;;  %430 = vst [vmem:[%s2316_s4 + $0x30] sm:$0xff] %v416_v48 }
 0x10a PF: > { %v1935_v49 = vld [vmem:[%s1813_s29 + $0x78] sm:$0xff]  ;;  %v1749_v50 = vmov 0.0   ;;  %v1939_v51 = vld [vmem:[%s1813_s29 + $0x70] sm:$0xff]  ;;  %vm1750_vm0 = vmmov 0   ;;  %v1947_v52 = vld [vmem:[%s1813_s29 + $0x68] sm:$0xff] }
 0x10b   : > { %1371 = vmatprep.subr.mxu0 %v1749_v50  ;;  %1403 = vmatprep.mubr.msk.f32.mxu0 %vm1750_vm0, %v1749_v50  ;;  %v1954_v53 = vld [vmem:[%s1813_s29 + $0x60] sm:$0xff]  ;;  %v1961_v54 = vld [vmem:[%s1813_s29 + $0x58] sm:$0xff]  ;;  %v1968_v55 = vld [vmem:[%s1813_s29 + $0x50] sm:$0xff] }
 0x10c   : > { %1372 = vmatpush3.msra.mxu0 %v1935_v49  ;;  %1406 = vmatprep.subr.mxu1 %v1749_v50  ;;  %v1975_v56 = vld [vmem:[%s1813_s29 + $0x48] sm:$0xff]  ;;  %v1982_v57 = vld [vmem:[%s1813_s29 + $0x40] sm:$0xff]  ;;  %v1989_v58 = vld [vmem:[%s1813_s29 + $0x38] sm:$0xff] }
 0x10d   : > { %1373 = vmatprep.subr.mxu0 %v1749_v50  ;;  %1407 = vmatpush3.msra.mxu1 %v1935_v49  ;;  %v1996_v59 = vld [vmem:[%s1813_s29 + $0x30] sm:$0xff]  ;;  %v2003_v60 = vld [vmem:[%s1813_s29 + $0x28] sm:$0xff]  ;;  %v2010_v61 = vld [vmem:[%s1813_s29 + $0x20] sm:$0xff] }
 0x10e   : > { %1374 = vmatpush3.msra.mxu0 %v1939_v51  ;;  %1408 = vmatprep.subr.mxu1 %v1749_v50  ;;  %v2017_v62 = vld [vmem:[%s1813_s29 + $0x18] sm:$0xff]  ;;  %v2024_v63 = vld [vmem:[%s1813_s29 + $0x10] sm:$0xff]  ;;  %v2031_v0 = vld [vmem:[%s1813_s29 + $0x8] sm:$0xff] }
 0x10f   : > { %1375 = vmatprep.subr.mxu0 %v1749_v50  ;;  %1409 = vmatpush3.msra.mxu1 %v1939_v51  ;;  %v2038_v1 = vld [vmem:[%s1813_s29] sm:$0xff]  ;;  %v1148_v7 = vld [vmem:[%s2316_s4 + $0x8] sm:$0xff]  ;;  %v1152_v17 = vld [vmem:[%s2316_s4 + $0x18] sm:$0xff] }
 0x110   : > { %1376 = vmatpush3.msra.mxu0 %v1947_v52  ;;  %1410 = vmatprep.subr.mxu1 %v1749_v50  ;;  %v448_v2 = vld [vmem:[%s2316_s4] sm:$0xff]  ;;  %v1150_v12 = vld [vmem:[%s2316_s4 + $0x10] sm:$0xff]  ;;  %v1156_v27 = vld [vmem:[%s2316_s4 + $0x28] sm:$0xff] }
 0x111   : > { %1377 = vmatprep.subr.mxu0 %v1749_v50  ;;  %1411 = vmatpush3.msra.mxu1 %v1947_v52  ;;  %v1154_v22 = vld [vmem:[%s2316_s4 + $0x20] sm:$0xff]  ;;  %v1158_v32 = vld [vmem:[%s2316_s4 + $0x30] sm:$0xff]  ;;  %v1160_v37 = vld [vmem:[%s2316_s4 + $0x38] sm:$0xff] }
 0x112   : > { %1378 = vmatpush3.msra.mxu0 %v1954_v53  ;;  %1412 = vmatprep.subr.mxu1 %v1749_v50 }
 0x113   : > { %1379 = vmatprep.subr.mxu0 %v1749_v50  ;;  %1413 = vmatpush3.msra.mxu1 %v1954_v53 }
 0x114   : > { %1380 = vmatpush3.msra.mxu0 %v1961_v54  ;;  %1414 = vmatprep.subr.mxu1 %v1749_v50 }
 0x115   : > { %1381 = vmatprep.subr.mxu0 %v1749_v50  ;;  %1415 = vmatpush3.msra.mxu1 %v1961_v54 }
 0x116   : > { %1382 = vmatpush3.msra.mxu0 %v1968_v55  ;;  %1416 = vmatprep.subr.mxu1 %v1749_v50 }
 0x117   : > { %1383 = vmatprep.subr.mxu0 %v1749_v50  ;;  %1417 = vmatpush3.msra.mxu1 %v1968_v55 }
 0x118   : > { %1384 = vmatpush3.msra.mxu0 %v1975_v56  ;;  %1418 = vmatprep.subr.mxu1 %v1749_v50 }
 0x119   : > { %1385 = vmatprep.subr.mxu0 %v1749_v50  ;;  %1419 = vmatpush3.msra.mxu1 %v1975_v56 }
 0x11a   : > { %1386 = vmatpush3.msra.mxu0 %v1982_v57  ;;  %1420 = vmatprep.subr.mxu1 %v1749_v50 }
 0x11b   : > { %1387 = vmatprep.subr.mxu0 %v1749_v50  ;;  %1421 = vmatpush3.msra.mxu1 %v1982_v57 }
 0x11c   : > { %1388 = vmatpush3.msra.mxu0 %v1989_v58  ;;  %1422 = vmatprep.subr.mxu1 %v1749_v50 }
 0x11d   : > { %1389 = vmatprep.subr.mxu0 %v1749_v50  ;;  %1423 = vmatpush3.msra.mxu1 %v1989_v58 }
 0x11e   : > { %1390 = vmatpush3.msra.mxu0 %v1996_v59  ;;  %1424 = vmatprep.subr.mxu1 %v1749_v50 }
 0x11f   : > { %1391 = vmatprep.subr.mxu0 %v1749_v50  ;;  %1425 = vmatpush3.msra.mxu1 %v1996_v59 }
 0x120   : > { %1392 = vmatpush3.msra.mxu0 %v2003_v60  ;;  %1426 = vmatprep.subr.mxu1 %v1749_v50 }
 0x121   : > { %1393 = vmatprep.subr.mxu0 %v1749_v50  ;;  %1427 = vmatpush3.msra.mxu1 %v2003_v60 }
 0x122   : > { %1394 = vmatpush3.msra.mxu0 %v2010_v61  ;;  %1428 = vmatprep.subr.mxu1 %v1749_v50 }
 0x123   : > { %1395 = vmatprep.subr.mxu0 %v1749_v50  ;;  %1429 = vmatpush3.msra.mxu1 %v2010_v61 }
 0x124   : > { %1396 = vmatpush3.msra.mxu0 %v2017_v62  ;;  %1430 = vmatprep.subr.mxu1 %v1749_v50 }
 0x125   : > { %1397 = vmatprep.subr.mxu0 %v1749_v50  ;;  %1431 = vmatpush3.msra.mxu1 %v2017_v62 }
 0x126   : > { %1398 = vmatpush3.msra.mxu0 %v2024_v63  ;;  %1432 = vmatprep.subr.mxu1 %v1749_v50 }
 0x127   : > { %1399 = vmatprep.subr.mxu0 %v1749_v50  ;;  %1433 = vmatpush3.msra.mxu1 %v2024_v63 }
 0x128   : > { %1400 = vmatpush3.msra.mxu0 %v2031_v0  ;;  %1434 = vmatprep.subr.mxu1 %v1749_v50 }
 0x129   : > { %1401 = vmatprep.subr.mxu0 %v1749_v50  ;;  %1435 = vmatpush3.msra.mxu1 %v2031_v0 }
 0x12a   : > { %1402 = vmatpush3.msra.mxu0 %v2038_v1  ;;  %1436 = vmatprep.subr.mxu1 %v1749_v50 }
 0x12b   : > { %1404 = vmatmul.mubr.f32.vlgmr.msra.gmra.mxu0 %v1749_v50  ;;  %1437 = vmatpush3.msra.mxu1 %v2038_v1 }
 0x12c   : > { %1438 = vmatprep.mubr.msk.f32.mxu1 %vm1750_vm0, %v1749_v50  ;;  %1441 = vmatprep.subr.mxu0 %v1749_v50 }
 0x12d   : > { %1442 = vmatpush3.msra.mxu0 %v1935_v49  ;;  %1473 = vmatprep.mubr.msk.f32.mxu0 %vm1750_vm0, %v1749_v50 }
 0x12e   : > { %1443 = vmatprep.subr.mxu0 %v1749_v50  ;;  %1476 = vmatprep.subr.mxu1 %v1749_v50 }
 0x12f   : > { %1444 = vmatpush3.msra.mxu0 %v1939_v51 }
 0x130   : > { %1445 = vmatprep.subr.mxu0 %v1749_v50 }
 0x131   : > { %1446 = vmatpush3.msra.mxu0 %v1947_v52 }
 0x132   : > { %1447 = vmatprep.subr.mxu0 %v1749_v50 }
 0x133   : > { %1448 = vmatpush3.msra.mxu0 %v1954_v53 }
 0x134   : > { %1449 = vmatprep.subr.mxu0 %v1749_v50 }
 0x135   : > { %1450 = vmatpush3.msra.mxu0 %v1961_v54 }
 0x136   : > { %1451 = vmatprep.subr.mxu0 %v1749_v50 }
 0x137   : > { %1452 = vmatpush3.msra.mxu0 %v1968_v55 }
 0x138   : > { %1453 = vmatprep.subr.mxu0 %v1749_v50 }
 0x139   : > { %1454 = vmatpush3.msra.mxu0 %v1975_v56 }
 0x13a   : > { %1455 = vmatprep.subr.mxu0 %v1749_v50 }
 0x13b   : > { %1456 = vmatpush3.msra.mxu0 %v1982_v57 }
 0x13c   : > { %1457 = vmatprep.subr.mxu0 %v1749_v50 }
 0x13d   : > { %1458 = vmatpush3.msra.mxu0 %v1989_v58 }
 0x13e   : > { %1459 = vmatprep.subr.mxu0 %v1749_v50 }
 0x13f   : > { %1460 = vmatpush3.msra.mxu0 %v1996_v59 }
 0x140   : > { %1461 = vmatprep.subr.mxu0 %v1749_v50 }
 0x141   : > { %1462 = vmatpush3.msra.mxu0 %v2003_v60 }
 0x142   : > { %1463 = vmatprep.subr.mxu0 %v1749_v50 }
 0x143   : > { %1464 = vmatpush3.msra.mxu0 %v2010_v61 }
 0x144   : > { %1465 = vmatprep.subr.mxu0 %v1749_v50 }
 0x145   : > { %1466 = vmatpush3.msra.mxu0 %v2017_v62 }
 0x146   : > { %1467 = vmatprep.subr.mxu0 %v1749_v50 }
 0x147   : > { %1468 = vmatpush3.msra.mxu0 %v2024_v63 }
 0x148   : > { %1469 = vmatprep.subr.mxu0 %v1749_v50 }
 0x149   : > { %1470 = vmatpush3.msra.mxu0 %v2031_v0 }
 0x14a   : > { %1471 = vmatprep.subr.mxu0 %v1749_v50 }
 0x14b   : > { %1472 = vmatpush3.msra.mxu0 %v2038_v1 }
 0x14c   : > { %1511 = vmatprep.subr.mxu0 %v1749_v50 }
 0x1eb   : > { %v515_v3 = vpop.f32.mrf.mxu0 }
 0x1ec   : > { %v516_v4 = vadd.f32 %v515_v3, %v448_v2 }
 0x1ed   : > { %v1405_v5 = vpop.f32.mrf.mxu0 }
 0x1ee   : > { %1709 = vtanh.f32 %v516_v4 }
 0x1fb   : > { %v1710_v6 = vpop.eup %1709 }
 0x1fc   : > { %520 = vst [vmem:[%s2316_s4] sm:$0xff] %v1710_v6  ;;  %1439 = vmatmul.mubr.f32.vlgmr.msra.gmra.mxu1 %v1710_v6 }
 0x1fd   : > { %1477 = vmatpush3.msra.mxu1 %v1935_v49  ;;  %1508 = vmatprep.mubr.msk.f32.mxu1 %vm1750_vm0, %v1749_v50 }
 0x1fe   : > { %1478 = vmatprep.subr.mxu1 %v1749_v50 }
 0x1ff   : > { %1479 = vmatpush3.msra.mxu1 %v1939_v51 }
 0x200   : > { %1480 = vmatprep.subr.mxu1 %v1749_v50 }
 0x201   : > { %1481 = vmatpush3.msra.mxu1 %v1947_v52 }
 0x202   : > { %1482 = vmatprep.subr.mxu1 %v1749_v50 }
 0x203   : > { %1483 = vmatpush3.msra.mxu1 %v1954_v53 }
 0x204   : > { %1484 = vmatprep.subr.mxu1 %v1749_v50 }
 0x205   : > { %1485 = vmatpush3.msra.mxu1 %v1961_v54 }
 0x206   : > { %1486 = vmatprep.subr.mxu1 %v1749_v50 }
 0x207   : > { %1487 = vmatpush3.msra.mxu1 %v1968_v55 }
 0x208   : > { %1488 = vmatprep.subr.mxu1 %v1749_v50 }
 0x209   : > { %1489 = vmatpush3.msra.mxu1 %v1975_v56 }
 0x20a   : > { %1490 = vmatprep.subr.mxu1 %v1749_v50 }
 0x20b   : > { %1491 = vmatpush3.msra.mxu1 %v1982_v57 }
 0x20c   : > { %1492 = vmatprep.subr.mxu1 %v1749_v50 }
 0x20d   : > { %1493 = vmatpush3.msra.mxu1 %v1989_v58 }
 0x20e   : > { %1494 = vmatprep.subr.mxu1 %v1749_v50 }
 0x20f   : > { %1495 = vmatpush3.msra.mxu1 %v1996_v59 }
 0x210   : > { %1496 = vmatprep.subr.mxu1 %v1749_v50 }
 0x211   : > { %1497 = vmatpush3.msra.mxu1 %v2003_v60 }
 0x212   : > { %1498 = vmatprep.subr.mxu1 %v1749_v50 }
 0x213   : > { %1499 = vmatpush3.msra.mxu1 %v2010_v61 }
 0x214   : > { %1500 = vmatprep.subr.mxu1 %v1749_v50 }
 0x215   : > { %1501 = vmatpush3.msra.mxu1 %v2017_v62 }
 0x216   : > { %1502 = vmatprep.subr.mxu1 %v1749_v50 }
 0x217   : > { %1503 = vmatpush3.msra.mxu1 %v2024_v63 }
 0x218   : > { %1504 = vmatprep.subr.mxu1 %v1749_v50 }
 0x219   : > { %1505 = vmatpush3.msra.mxu1 %v2031_v0 }
 0x21a   : > { %1506 = vmatprep.subr.mxu1 %v1749_v50 }
 0x21b   : > { %1507 = vmatpush3.msra.mxu1 %v2038_v1 }
 0x21c   : > { %1546 = vmatprep.subr.mxu1 %v1749_v50 }
 0x2bc   : > { %v589_v8 = vpop.f32.mrf.mxu1 }
 0x2bd   : > { %v590_v9 = vadd.f32 %v1148_v7, %v589_v8 }
 0x2be   : > { %v1440_v10 = vpop.f32.mrf.mxu1 }
 0x2bf   : > { %1711 = vtanh.f32 %v590_v9 }
 0x2cc   : > { %v1712_v11 = vpop.eup %1711 }
 0x2cd   : > { %1149 = vst [vmem:[%s2316_s4 + $0x8] sm:$0xff] %v1712_v11  ;;  %1474 = vmatmul.mubr.f32.vlgmr.msra.gmra.mxu0 %v1712_v11 }
 0x2ce   : > { %1512 = vmatpush3.msra.mxu0 %v1935_v49  ;;  %1543 = vmatprep.mubr.msk.f32.mxu0 %vm1750_vm0, %v1749_v50 }
 0x2cf   : > { %1513 = vmatprep.subr.mxu0 %v1749_v50 }
 0x2d0   : > { %1514 = vmatpush3.msra.mxu0 %v1939_v51 }
 0x2d1   : > { %1515 = vmatprep.subr.mxu0 %v1749_v50 }
 0x2d2   : > { %1516 = vmatpush3.msra.mxu0 %v1947_v52 }
 0x2d3   : > { %1517 = vmatprep.subr.mxu0 %v1749_v50 }
 0x2d4   : > { %1518 = vmatpush3.msra.mxu0 %v1954_v53 }
 0x2d5   : > { %1519 = vmatprep.subr.mxu0 %v1749_v50 }
 0x2d6   : > { %1520 = vmatpush3.msra.mxu0 %v1961_v54 }
 0x2d7   : > { %1521 = vmatprep.subr.mxu0 %v1749_v50 }
 0x2d8   : > { %1522 = vmatpush3.msra.mxu0 %v1968_v55 }
 0x2d9   : > { %1523 = vmatprep.subr.mxu0 %v1749_v50 }
 0x2da   : > { %1524 = vmatpush3.msra.mxu0 %v1975_v56 }
 0x2db   : > { %1525 = vmatprep.subr.mxu0 %v1749_v50 }
 0x2dc   : > { %1526 = vmatpush3.msra.mxu0 %v1982_v57 }
 0x2dd   : > { %1527 = vmatprep.subr.mxu0 %v1749_v50 }
 0x2de   : > { %1528 = vmatpush3.msra.mxu0 %v1989_v58 }
 0x2df   : > { %1529 = vmatprep.subr.mxu0 %v1749_v50 }
 0x2e0   : > { %1530 = vmatpush3.msra.mxu0 %v1996_v59 }
 0x2e1   : > { %1531 = vmatprep.subr.mxu0 %v1749_v50 }
 0x2e2   : > { %1532 = vmatpush3.msra.mxu0 %v2003_v60 }
 0x2e3   : > { %1533 = vmatprep.subr.mxu0 %v1749_v50 }
 0x2e4   : > { %1534 = vmatpush3.msra.mxu0 %v2010_v61 }
 0x2e5   : > { %1535 = vmatprep.subr.mxu0 %v1749_v50 }
 0x2e6   : > { %1536 = vmatpush3.msra.mxu0 %v2017_v62 }
 0x2e7   : > { %1537 = vmatprep.subr.mxu0 %v1749_v50 }
 0x2e8   : > { %1538 = vmatpush3.msra.mxu0 %v2024_v63 }
 0x2e9   : > { %1539 = vmatprep.subr.mxu0 %v1749_v50 }
 0x2ea   : > { %1540 = vmatpush3.msra.mxu0 %v2031_v0 }
 0x2eb   : > { %1541 = vmatprep.subr.mxu0 %v1749_v50 }
 0x2ec   : > { %1542 = vmatpush3.msra.mxu0 %v2038_v1 }
 0x2ed   : > { %1581 = vmatprep.subr.mxu0 %v1749_v50 }
 0x38d   : > { %v663_v13 = vpop.f32.mrf.mxu0 }
 0x38e   : > { %v664_v14 = vadd.f32 %v1150_v12, %v663_v13 }
 0x38f   : > { %v1475_v15 = vpop.f32.mrf.mxu0 }
 0x390   : > { %1713 = vtanh.f32 %v664_v14 }
 0x39d   : > { %v1714_v16 = vpop.eup %1713 }
 0x39e   : > { %1151 = vst [vmem:[%s2316_s4 + $0x10] sm:$0xff] %v1714_v16  ;;  %1509 = vmatmul.mubr.f32.vlgmr.msra.gmra.mxu1 %v1714_v16 }
 0x39f   : > { %1547 = vmatpush3.msra.mxu1 %v1935_v49  ;;  %1578 = vmatprep.mubr.msk.f32.mxu1 %vm1750_vm0, %v1749_v50 }
 0x3a0   : > { %1548 = vmatprep.subr.mxu1 %v1749_v50 }
 0x3a1   : > { %1549 = vmatpush3.msra.mxu1 %v1939_v51 }
 0x3a2   : > { %1550 = vmatprep.subr.mxu1 %v1749_v50 }
 0x3a3   : > { %1551 = vmatpush3.msra.mxu1 %v1947_v52 }
 0x3a4   : > { %1552 = vmatprep.subr.mxu1 %v1749_v50 }
 0x3a5   : > { %1553 = vmatpush3.msra.mxu1 %v1954_v53 }
 0x3a6   : > { %1554 = vmatprep.subr.mxu1 %v1749_v50 }
 0x3a7   : > { %1555 = vmatpush3.msra.mxu1 %v1961_v54 }
 0x3a8   : > { %1556 = vmatprep.subr.mxu1 %v1749_v50 }
 0x3a9   : > { %1557 = vmatpush3.msra.mxu1 %v1968_v55 }
 0x3aa   : > { %1558 = vmatprep.subr.mxu1 %v1749_v50 }
 0x3ab   : > { %1559 = vmatpush3.msra.mxu1 %v1975_v56 }
 0x3ac   : > { %1560 = vmatprep.subr.mxu1 %v1749_v50 }
 0x3ad   : > { %1561 = vmatpush3.msra.mxu1 %v1982_v57 }
 0x3ae   : > { %1562 = vmatprep.subr.mxu1 %v1749_v50 }
 0x3af   : > { %1563 = vmatpush3.msra.mxu1 %v1989_v58 }
 0x3b0   : > { %1564 = vmatprep.subr.mxu1 %v1749_v50 }
 0x3b1   : > { %1565 = vmatpush3.msra.mxu1 %v1996_v59 }
 0x3b2   : > { %1566 = vmatprep.subr.mxu1 %v1749_v50 }
 0x3b3   : > { %1567 = vmatpush3.msra.mxu1 %v2003_v60 }
 0x3b4   : > { %1568 = vmatprep.subr.mxu1 %v1749_v50 }
 0x3b5   : > { %1569 = vmatpush3.msra.mxu1 %v2010_v61 }
 0x3b6   : > { %1570 = vmatprep.subr.mxu1 %v1749_v50 }
 0x3b7   : > { %1571 = vmatpush3.msra.mxu1 %v2017_v62 }
 0x3b8   : > { %1572 = vmatprep.subr.mxu1 %v1749_v50 }
 0x3b9   : > { %1573 = vmatpush3.msra.mxu1 %v2024_v63 }
 0x3ba   : > { %1574 = vmatprep.subr.mxu1 %v1749_v50 }
 0x3bb   : > { %1575 = vmatpush3.msra.mxu1 %v2031_v0 }
 0x3bc   : > { %1576 = vmatprep.subr.mxu1 %v1749_v50 }
 0x3bd   : > { %1577 = vmatpush3.msra.mxu1 %v2038_v1 }
 0x3be   : > { %1616 = vmatprep.subr.mxu1 %v1749_v50 }
 0x45e   : > { %v737_v18 = vpop.f32.mrf.mxu1 }
 0x45f   : > { %v738_v19 = vadd.f32 %v1152_v17, %v737_v18 }
 0x460   : > { %v1510_v20 = vpop.f32.mrf.mxu1 }
 0x461   : > { %1715 = vtanh.f32 %v738_v19 }
 0x46e   : > { %v1716_v21 = vpop.eup %1715 }
 0x46f   : > { %1153 = vst [vmem:[%s2316_s4 + $0x18] sm:$0xff] %v1716_v21  ;;  %1544 = vmatmul.mubr.f32.vlgmr.msra.gmra.mxu0 %v1716_v21 }
 0x470   : > { %1582 = vmatpush3.msra.mxu0 %v1935_v49  ;;  %1613 = vmatprep.mubr.msk.f32.mxu0 %vm1750_vm0, %v1749_v50 }
 0x471   : > { %1583 = vmatprep.subr.mxu0 %v1749_v50 }
 0x472   : > { %1584 = vmatpush3.msra.mxu0 %v1939_v51 }
 0x473   : > { %1585 = vmatprep.subr.mxu0 %v1749_v50 }
 0x474   : > { %1586 = vmatpush3.msra.mxu0 %v1947_v52 }
 0x475   : > { %1587 = vmatprep.subr.mxu0 %v1749_v50 }
 0x476   : > { %1588 = vmatpush3.msra.mxu0 %v1954_v53 }
 0x477   : > { %1589 = vmatprep.subr.mxu0 %v1749_v50 }
 0x478   : > { %1590 = vmatpush3.msra.mxu0 %v1961_v54 }
 0x479   : > { %1591 = vmatprep.subr.mxu0 %v1749_v50 }
 0x47a   : > { %1592 = vmatpush3.msra.mxu0 %v1968_v55 }
 0x47b   : > { %1593 = vmatprep.subr.mxu0 %v1749_v50 }
 0x47c   : > { %1594 = vmatpush3.msra.mxu0 %v1975_v56 }
 0x47d   : > { %1595 = vmatprep.subr.mxu0 %v1749_v50 }
 0x47e   : > { %1596 = vmatpush3.msra.mxu0 %v1982_v57 }
 0x47f   : > { %1597 = vmatprep.subr.mxu0 %v1749_v50 }
 0x480   : > { %1598 = vmatpush3.msra.mxu0 %v1989_v58 }
 0x481   : > { %1599 = vmatprep.subr.mxu0 %v1749_v50 }
 0x482   : > { %1600 = vmatpush3.msra.mxu0 %v1996_v59 }
 0x483   : > { %1601 = vmatprep.subr.mxu0 %v1749_v50 }
 0x484   : > { %1602 = vmatpush3.msra.mxu0 %v2003_v60 }
 0x485   : > { %1603 = vmatprep.subr.mxu0 %v1749_v50 }
 0x486   : > { %1604 = vmatpush3.msra.mxu0 %v2010_v61 }
 0x487   : > { %1605 = vmatprep.subr.mxu0 %v1749_v50 }
 0x488   : > { %1606 = vmatpush3.msra.mxu0 %v2017_v62 }
 0x489   : > { %1607 = vmatprep.subr.mxu0 %v1749_v50 }
 0x48a   : > { %1608 = vmatpush3.msra.mxu0 %v2024_v63 }
 0x48b   : > { %1609 = vmatprep.subr.mxu0 %v1749_v50 }
 0x48c   : > { %1610 = vmatpush3.msra.mxu0 %v2031_v0 }
 0x48d   : > { %1611 = vmatprep.subr.mxu0 %v1749_v50 }
 0x48e   : > { %1612 = vmatpush3.msra.mxu0 %v2038_v1 }
 0x52f   : > { %v811_v23 = vpop.f32.mrf.mxu0 }
 0x530   : > { %v812_v24 = vadd.f32 %v1154_v22, %v811_v23 }
 0x531   : > { %v1545_v25 = vpop.f32.mrf.mxu0 }
 0x532   : > { %1717 = vtanh.f32 %v812_v24 }
 0x53f   : > { %v1718_v26 = vpop.eup %1717 }
 0x540   : > { %1155 = vst [vmem:[%s2316_s4 + $0x20] sm:$0xff] %v1718_v26  ;;  %1579 = vmatmul.mubr.f32.vlgmr.msra.gmra.mxu1 %v1718_v26 }
 0x541   : > { %1617 = vmatpush3.msra.mxu1 %v1935_v49  ;;  %1648 = vmatprep.mubr.msk.f32.mxu1 %vm1750_vm0, %v1749_v50 }
 0x542   : > { %1618 = vmatprep.subr.mxu1 %v1749_v50 }
 0x543   : > { %1619 = vmatpush3.msra.mxu1 %v1939_v51 }
 0x544   : > { %1620 = vmatprep.subr.mxu1 %v1749_v50 }
 0x545   : > { %1621 = vmatpush3.msra.mxu1 %v1947_v52 }
 0x546   : > { %1622 = vmatprep.subr.mxu1 %v1749_v50 }
 0x547   : > { %1623 = vmatpush3.msra.mxu1 %v1954_v53 }
 0x548   : > { %1624 = vmatprep.subr.mxu1 %v1749_v50 }
 0x549   : > { %1625 = vmatpush3.msra.mxu1 %v1961_v54 }
 0x54a   : > { %1626 = vmatprep.subr.mxu1 %v1749_v50 }
 0x54b   : > { %1627 = vmatpush3.msra.mxu1 %v1968_v55 }
 0x54c   : > { %1628 = vmatprep.subr.mxu1 %v1749_v50 }
 0x54d   : > { %1629 = vmatpush3.msra.mxu1 %v1975_v56 }
 0x54e   : > { %1630 = vmatprep.subr.mxu1 %v1749_v50 }
 0x54f   : > { %1631 = vmatpush3.msra.mxu1 %v1982_v57 }
 0x550   : > { %1632 = vmatprep.subr.mxu1 %v1749_v50 }
 0x551   : > { %1633 = vmatpush3.msra.mxu1 %v1989_v58 }
 0x552   : > { %1634 = vmatprep.subr.mxu1 %v1749_v50 }
 0x553   : > { %1635 = vmatpush3.msra.mxu1 %v1996_v59 }
 0x554   : > { %1636 = vmatprep.subr.mxu1 %v1749_v50 }
 0x555   : > { %1637 = vmatpush3.msra.mxu1 %v2003_v60 }
 0x556   : > { %1638 = vmatprep.subr.mxu1 %v1749_v50 }
 0x557   : > { %1639 = vmatpush3.msra.mxu1 %v2010_v61 }
 0x558   : > { %1640 = vmatprep.subr.mxu1 %v1749_v50 }
 0x559   : > { %1641 = vmatpush3.msra.mxu1 %v2017_v62 }
 0x55a   : > { %1642 = vmatprep.subr.mxu1 %v1749_v50 }
 0x55b   : > { %1643 = vmatpush3.msra.mxu1 %v2024_v63 }
 0x55c   : > { %1644 = vmatprep.subr.mxu1 %v1749_v50 }
 0x55d   : > { %1645 = vmatpush3.msra.mxu1 %v2031_v0 }
 0x55e   : > { %1646 = vmatprep.subr.mxu1 %v1749_v50 }
 0x55f   : > { %1647 = vmatpush3.msra.mxu1 %v2038_v1 }
 0x600   : > { %v885_v28 = vpop.f32.mrf.mxu1 }
 0x601   : > { %v886_v29 = vadd.f32 %v1156_v27, %v885_v28 }
 0x602   : > { %v1580_v30 = vpop.f32.mrf.mxu1 }
 0x603   : > { %1719 = vtanh.f32 %v886_v29 }
 0x610   : > { %v1720_v31 = vpop.eup %1719 }
 0x611   : > { %1157 = vst [vmem:[%s2316_s4 + $0x28] sm:$0xff] %v1720_v31  ;;  %1614 = vmatmul.mubr.f32.vlgmr.msra.gmra.mxu0 %v1720_v31 }
 0x6d1   : > { %v959_v33 = vpop.f32.mrf.mxu0 }
 0x6d2   : > { %v960_v34 = vadd.f32 %v1158_v32, %v959_v33 }
 0x6d3   : > { %v1615_v35 = vpop.f32.mrf.mxu0 }
 0x6d4   : > { %1721 = vtanh.f32 %v960_v34 }
 0x6e1   : > { %v1722_v36 = vpop.eup %1721 }
 0x6e2   : > { %1159 = vst [vmem:[%s2316_s4 + $0x30] sm:$0xff] %v1722_v36  ;;  %1649 = vmatmul.mubr.f32.vlgmr.msra.gmra.mxu1 %v1722_v36 }
 0x7a2   : > { %v1033_v38 = vpop.f32.mrf.mxu1 }
 0x7a3   : > { %v1034_v39 = vadd.f32 %v1160_v37, %v1033_v38 }
 0x7a4   : > { %v1650_v40 = vpop.f32.mrf.mxu1 }
 0x7a5   : > { %1723 = vtanh.f32 %v1034_v39 }
 0x7b2   : > { %v1724_v41 = vpop.eup %1723 }
 0x7b3   : > { %1161 = vst [vmem:[%s2316_s4 + $0x38] sm:$0xff] %v1724_v41 }
 0x7b4 PF: > { %s14_s17 = sadd.s32 1, %s1747_s17   ;;  %s2317_s15 = smov %s1743_s16 }
 0x7b5   : > { %p11_p7 = scmp.ge.s32.totalorder %s14_s17, 4   ;;  %s2318_s16 = smov %s2320_s18 }
 0x7b7   :  { %13 = sbr.rel (!%p11_p7) target bundleno = 2 (0x2), region = 90 }

</bundles_post_ra>
